<compile_context>
chip_gen: v5e
topology: v5e:2x2
jax: 0.10.0
libtpu: 0.0.40
codegen_flags: <defaults>
</compile_context>

<pallas_src>
import jax
import jax.numpy as jnp
from jax.experimental import pallas as pl
from jax.experimental.pallas import tpu as pltpu


def _cdiv(a, b):
    return -(-a // b)


def _mlp_kernel(x_ref, w1t_ref, b1_ref, w2t_ref, b2_ref, o_ref):
    # x_ref:  (TM, 3)    w1t_ref: (3, 5)   b1_ref: (1, 5)  (bias already + other)
    # w2t_ref: (5, 6)    b2_ref:  (1, 6)   o_ref:  (TM, 6)
    x = x_ref[...]
    h = jnp.dot(x, w1t_ref[...], preferred_element_type=jnp.float32) + b1_ref[...]
    h = jnp.maximum(h, 0.0)                          # relu
    y = jnp.dot(h, w2t_ref[...], preferred_element_type=jnp.float32) + b2_ref[...]
    o_ref[...] = y.astype(o_ref.dtype)


def _num_tensorcores():
    """Best-effort detection of TensorCores per chip (v7x has 2)."""
    try:
        kind = jax.devices()[0].device_kind.lower()
    except Exception:
        return 1
    return 2 if ("v7" in kind or "7x" in kind) else 1


def _pick_tiling(m_rows, max_tile_m, num_cores):
    """Choose (tile_m, n_tiles) for the row axis.

    * Single-TC parts (v5e/v6e): grid is a serial loop -> fewest steps that
      keep each block within max_tile_m.
    * 2-TC parts (v7x): round the step count to a multiple of the core count
      so both cores get balanced work.
    Blocks never require padding the array: either the block equals the full
    row extent, or it is a multiple of 8 sublanes and Pallas masks the ragged
    final block.
    """
    max_tile_m = max(8, (max_tile_m // 8) * 8)
    if num_cores > 1 and m_rows > 16 * num_cores:
        n = max(num_cores, _cdiv(m_rows, max_tile_m))
        n = _cdiv(n, num_cores) * num_cores
        tile_m = _cdiv(_cdiv(m_rows, n), 8) * 8
        return tile_m, _cdiv(m_rows, tile_m)
    if m_rows <= max_tile_m:
        return m_rows, 1                       # one full-extent block
    return max_tile_m, _cdiv(m_rows, max_tile_m)


def mlp_forward(x1, other, w1, b1, w2, b2, *, max_tile_m=2048):
    """x1: (..., 3), other: (1, 5), w1: (5, 3), b1: (5,), w2: (6, 5), b2: (6,).
    Returns (..., 6).  Weights are in torch Linear layout (out, in)."""
    lead_shape = x1.shape[:-1]
    in_dim = x1.shape[-1]          # 3
    h_dim = w1.shape[0]            # 5
    out_dim = w2.shape[0]          # 6

    # Fold the (1, h_dim) row-broadcast `other` into the first bias (exact,
    # since `other` broadcasts identically over every row).
    b1_eff = (b1.reshape(-1) + other.reshape(-1)).reshape(1, h_dim).astype(jnp.float32)
    b2_row = b2.reshape(1, out_dim).astype(jnp.float32)
    w1t = w1.T.astype(jnp.float32)             # (3, 5)  tiny, resident in VMEM
    w2t = w2.T.astype(jnp.float32)             # (5, 6)  tiny, resident in VMEM

    x2d = x1.reshape(-1, in_dim)               # metadata-only reshape, no HBM copy
    M = x2d.shape[0]
    tile_m, n_tiles = _pick_tiling(M, max_tile_m, _num_tensorcores())

    out2d = pl.pallas_call(
        _mlp_kernel,
        out_shape=jax.ShapeDtypeStruct((M, out_dim), x1.dtype),
        grid_spec=pltpu.PrefetchScalarGridSpec(
            num_scalar_prefetch=0,
            grid=(n_tiles,),
            in_specs=[
                pl.BlockSpec((tile_m, in_dim), lambda i: (i, 0)),   # x rows
                pl.BlockSpec((in_dim, h_dim), lambda i: (0, 0)),    # W1^T (3,5)
                pl.BlockSpec((1, h_dim), lambda i: (0, 0)),         # b1 + other
                pl.BlockSpec((h_dim, out_dim), lambda i: (0, 0)),   # W2^T (5,6)
                pl.BlockSpec((1, out_dim), lambda i: (0, 0)),       # b2
            ],
            out_specs=pl.BlockSpec((tile_m, out_dim), lambda i: (i, 0)),
        ),
        compiler_params=pltpu.CompilerParams(
            dimension_semantics=("parallel",)),
    )(x2d, w1t, b1_eff, w2t, b2_row)

    return out2d.reshape(*lead_shape, out_dim)


def reference(x1, other, w1, b1, w2, b2):
    v1 = x1 @ w1.T + b1
    v2 = v1 + other
    v3 = jnp.maximum(v2, 0.0)
    return v3 @ w2.T + b2


if __name__ == "__main__":
    key = jax.random.PRNGKey(0)
    k_x, k_o, k_w1, k_b1, k_w2, k_b2 = jax.random.split(key, 6)

    # Small shapes consistent with the module: Linear(3->5), Linear(5->6)
    # applied over the trailing feature dim.  M = 2*8*16 = 256 rows.
    x1 = jax.random.normal(k_x, (2, 8, 16, 3), dtype=jnp.float32)
    other = jax.random.normal(k_o, (1, 5), dtype=jnp.float32)

    # Parameters in torch Linear layout: weight (out, in), bias (out,)
    w1 = jax.random.normal(k_w1, (5, 3), dtype=jnp.float32) * 0.5
    b1 = jax.random.normal(k_b1, (5,), dtype=jnp.float32) * 0.1
    w2 = jax.random.normal(k_w2, (6, 5), dtype=jnp.float32) * 0.5
    b2 = jax.random.normal(k_b2, (6,), dtype=jnp.float32) * 0.1

    out = mlp_forward(x1, other, w1, b1, w2, b2)
    out = jax.block_until_ready(out)
    ref = reference(x1, other, w1, b1, w2, b2)
    assert out.shape == (2, 8, 16, 6), out.shape
    assert jnp.allclose(out, ref, atol=1e-5, rtol=1e-5), "mismatch vs reference"

    # Second check: larger row count -> multi-step grid path.
    x1b = jax.random.normal(k_x, (1, 48, 128, 3), dtype=jnp.float32)   # M = 6144
    outb = jax.block_until_ready(mlp_forward(x1b, other, w1, b1, w2, b2))
    refb = reference(x1b, other, w1, b1, w2, b2)
    assert outb.shape == (1, 48, 128, 6), outb.shape
    assert jnp.allclose(outb, refb, atol=1e-5, rtol=1e-5), "mismatch (multi-tile)"

    print("KERNEL_OK")
</pallas_src>

<mosaic_0001>
module attributes {stable_mosaic.version = 11 : i64} {
  func.func @_mlp_kernel(%arg0: i32, %arg1: memref<256x3xf32, #tpu.memory_space<vmem>>, %arg2: memref<3x5xf32, #tpu.memory_space<vmem>>, %arg3: memref<1x5xf32, #tpu.memory_space<vmem>>, %arg4: memref<5x6xf32, #tpu.memory_space<vmem>>, %arg5: memref<1x6xf32, #tpu.memory_space<vmem>>, %arg6: memref<256x6xf32, #tpu.memory_space<vmem>>) attributes {dimension_semantics = [#tpu.dimension_semantics<parallel>], iteration_bounds = array<i64: 1>, scalar_prefetch = 0 : i64, scratch_operands = 0 : i64, tpu.core_type = #tpu.core_type<tc>, window_params = [{transform_indices = @transform_0, window_bounds = array<i64: 256, 3>}, {pipeline_mode = #tpu.pipeline_mode<synchronous>, transform_indices = @transform_1, window_bounds = array<i64: 3, 5>}, {pipeline_mode = #tpu.pipeline_mode<synchronous>, transform_indices = @transform_2, window_bounds = array<i64: 1, 5>}, {pipeline_mode = #tpu.pipeline_mode<synchronous>, transform_indices = @transform_3, window_bounds = array<i64: 5, 6>}, {pipeline_mode = #tpu.pipeline_mode<synchronous>, transform_indices = @transform_4, window_bounds = array<i64: 1, 6>}, {transform_indices = @transform_5, window_bounds = array<i64: 256, 6>}]} {
    %c0 = arith.constant 0 : index
    %c0_0 = arith.constant 0 : index
    %0 = vector.load %arg1[%c0, %c0_0] : memref<256x3xf32, #tpu.memory_space<vmem>>, vector<256x3xf32>
    %c0_1 = arith.constant 0 : index
    %c0_2 = arith.constant 0 : index
    %1 = vector.load %arg2[%c0_1, %c0_2] : memref<3x5xf32, #tpu.memory_space<vmem>>, vector<3x5xf32>
    %cst = arith.constant dense<0.000000e+00> : vector<256x5xf32>
    %2 = tpu.matmul %0, %1, %cst {dimension_numbers = #tpu.dot_dimension_numbers<[1], [0], [0], [1], [0, 0, 1, 1], [], []>} : vector<256x3xf32>, vector<3x5xf32>, vector<256x5xf32> -> vector<256x5xf32>
    %c0_3 = arith.constant 0 : index
    %c0_4 = arith.constant 0 : index
    %3 = vector.load %arg3[%c0_3, %c0_4] : memref<1x5xf32, #tpu.memory_space<vmem>>, vector<1x5xf32>
    %4 = vector.broadcast %3 : vector<1x5xf32> to vector<256x5xf32>
    %5 = arith.addf %2, %4 : vector<256x5xf32>
    %cst_5 = arith.constant 0.000000e+00 : f32
    %6 = vector.broadcast %cst_5 : f32 to vector<256x5xf32>
    %7 = arith.maximumf %5, %6 : vector<256x5xf32>
    %c0_6 = arith.constant 0 : index
    %c0_7 = arith.constant 0 : index
    %8 = vector.load %arg4[%c0_6, %c0_7] : memref<5x6xf32, #tpu.memory_space<vmem>>, vector<5x6xf32>
    %cst_8 = arith.constant dense<0.000000e+00> : vector<256x6xf32>
    %9 = tpu.matmul %7, %8, %cst_8 {dimension_numbers = #tpu.dot_dimension_numbers<[1], [0], [0], [1], [0, 0, 1, 1], [], []>} : vector<256x5xf32>, vector<5x6xf32>, vector<256x6xf32> -> vector<256x6xf32>
    %c0_9 = arith.constant 0 : index
    %c0_10 = arith.constant 0 : index
    %10 = vector.load %arg5[%c0_9, %c0_10] : memref<1x6xf32, #tpu.memory_space<vmem>>, vector<1x6xf32>
    %11 = vector.broadcast %10 : vector<1x6xf32> to vector<256x6xf32>
    %12 = arith.addf %9, %11 : vector<256x6xf32>
    %c0_11 = arith.constant 0 : index
    %c0_12 = arith.constant 0 : index
    %13 = vector.load %arg6[%c0_11, %c0_12] : memref<256x6xf32, #tpu.memory_space<vmem>>, vector<256x6xf32>
    tpu.vector_store %arg6[%c0_11, %c0_12], %12 {strides = array<i32>} : memref<256x6xf32, #tpu.memory_space<vmem>>, vector<256x6xf32>,
    return
  }
  func.func @transform_0(%arg0: i32) -> (i32, i32) {
    %c0_i32 = arith.constant 0 : i32
    %c0_i32_0 = arith.constant 0 : i32
    return %arg0, %c0_i32 : i32, i32
  }
  func.func @transform_1(%arg0: i32) -> (i32, i32) {
    %c0_i32 = arith.constant 0 : i32
    %c0_i32_0 = arith.constant 0 : i32
    %c0_i32_1 = arith.constant 0 : i32
    return %c0_i32, %c0_i32_0 : i32, i32
  }
  func.func @transform_2(%arg0: i32) -> (i32, i32) {
    %c0_i32 = arith.constant 0 : i32
    %c0_i32_0 = arith.constant 0 : i32
    %c0_i32_1 = arith.constant 0 : i32
    return %c0_i32, %c0_i32_0 : i32, i32
  }
  func.func @transform_3(%arg0: i32) -> (i32, i32) {
    %c0_i32 = arith.constant 0 : i32
    %c0_i32_0 = arith.constant 0 : i32
    %c0_i32_1 = arith.constant 0 : i32
    return %c0_i32, %c0_i32_0 : i32, i32
  }
  func.func @transform_4(%arg0: i32) -> (i32, i32) {
    %c0_i32 = arith.constant 0 : i32
    %c0_i32_0 = arith.constant 0 : i32
    %c0_i32_1 = arith.constant 0 : i32
    return %c0_i32, %c0_i32_0 : i32, i32
  }
  func.func @transform_5(%arg0: i32) -> (i32, i32) {
    %c0_i32 = arith.constant 0 : i32
    %c0_i32_0 = arith.constant 0 : i32
    return %arg0, %c0_i32 : i32, i32
  }
}

</mosaic_0001>

<bundles_post_ra>
// kernel: tpu_custom_call.1
= control target key start
LH: loop header
LB: loop body
LE: loop exit
PB: predicated region body
PF: predicated region fallthrough
CT: control target
= control target key end

     0   :  { %vm154_vm0 = vcmask 1042432   ;;  %vm57_vm1 = vcmask 23552   ;;  %vm405_vm2 = vcmask 1044480   ;;  %vm308_vm3 = vcmask 39936   ;;  %s1027_s1 = inlined_call_operand.vmem [shape: f32[3,5], index: 1, kind: input, shape index: {}]   ;;  %s1028_s0 = inlined_call_operand.vmem [shape: f32[256,3], index: 0, kind: input, shape index: {}]   ;;  %s1029_s2 = inlined_call_operand.vmem [shape: f32[1,5], index: 2, kind: input, shape index: {}]   ;;  %s1030_s3 = inlined_call_operand.vmem [shape: f32[5,6], index: 3, kind: input, shape index: {}]   ;;  %s1031_s4 = inlined_call_operand.vmem [shape: f32[1,6], index: 4, kind: input, shape index: {}]   ;;  %s1032_s5 = inlined_call_operand.vmem [shape: f32[256,6], index: 5, kind: output, shape index: {}]  }
   0x1   :  { %v52_v0 = vld [vmem:[%s1027_s1] sm:$0x7]  ;;  %v37_v3 = vld [vmem:[%s1028_s0 + $0x88] sm:$0xff]  ;;  %v38_v5 = vld [vmem:[%s1028_s0 + $0x90] sm:$0xff]  ;;  %vm522_vm4 = vcmask 48128  }
   0x2   :  { %v36_v1 = vld [vmem:[%s1028_s0 + $0x80] sm:$0xff]  ;;  %625 = vmatpush.msk.msra.mxu2 %vm154_vm0, %v52_v0  ;;  %559 = vmatpush.msk.msra.mxu0 %vm154_vm0, %v52_v0  ;;  %v21_v4 = vld [vmem:[%s1028_s0 + $0x8] sm:$0xff]  ;;  %v22_v6 = vld [vmem:[%s1028_s0 + $0x10] sm:$0xff] }
   0x3   :  { %v20_v2 = vld [vmem:[%s1028_s0] sm:$0xff]  ;;  %576 = vmatmul.msk.f32.vlgmr.msra.gmra.mxu2 %vm57_vm1, %v36_v1  ;;  %v39_v7 = vld [vmem:[%s1028_s0 + $0x98] sm:$0xff]  ;;  %v41_v11 = vld [vmem:[%s1028_s0 + $0xa8] sm:$0xff] }
   0x4   :  { %560 = vmatmul.msk.f32.vlgmr.msra.gmra.mxu0 %vm57_vm1, %v20_v2  ;;  %v23_v8 = vld [vmem:[%s1028_s0 + $0x18] sm:$0xff]  ;;  %v40_v9 = vld [vmem:[%s1028_s0 + $0xa0] sm:$0xff]  ;;  %v25_v12 = vld [vmem:[%s1028_s0 + $0x28] sm:$0xff] }
   0x5   :  { %v24_v10 = vld [vmem:[%s1028_s0 + $0x20] sm:$0xff]  ;;  %v42_v13 = vld [vmem:[%s1028_s0 + $0xb0] sm:$0xff]  ;;  %v43_v15 = vld [vmem:[%s1028_s0 + $0xb8] sm:$0xff] }
   0x6   :  { %v26_v14 = vld [vmem:[%s1028_s0 + $0x30] sm:$0xff]  ;;  %v27_v16 = vld [vmem:[%s1028_s0 + $0x38] sm:$0xff]  ;;  %v44_v17 = vld [vmem:[%s1028_s0 + $0xc0] sm:$0xff] }
   0x7   :  { %v28_v18 = vld [vmem:[%s1028_s0 + $0x40] sm:$0xff]  ;;  %v45_v19 = vld [vmem:[%s1028_s0 + $0xc8] sm:$0xff]  ;;  %v46_v21 = vld [vmem:[%s1028_s0 + $0xd0] sm:$0xff] }
   0x8   :  { %v29_v20 = vld [vmem:[%s1028_s0 + $0x48] sm:$0xff]  ;;  %v30_v22 = vld [vmem:[%s1028_s0 + $0x50] sm:$0xff]  ;;  %v47_v23 = vld [vmem:[%s1028_s0 + $0xd8] sm:$0xff] }
   0x9   :  { %v31_v24 = vld [vmem:[%s1028_s0 + $0x58] sm:$0xff]  ;;  %v48_v25 = vld [vmem:[%s1028_s0 + $0xe0] sm:$0xff]  ;;  %v49_v27 = vld [vmem:[%s1028_s0 + $0xe8] sm:$0xff] }
   0xa   :  { %v32_v26 = vld [vmem:[%s1028_s0 + $0x60] sm:$0xff]  ;;  %v33_v28 = vld [vmem:[%s1028_s0 + $0x68] sm:$0xff]  ;;  %v50_v30 = vld [vmem:[%s1028_s0 + $0xf0] sm:$0xff] }
   0xb   :  { %577 = vmatmul.msk.f32.gmra.mxu2 %vm57_vm1, %v37_v3  ;;  %v303_v29 = vld [vmem:[%s1030_s3] sm:$0x1f]  ;;  %v34_v31 = vld [vmem:[%s1028_s0 + $0x70] sm:$0xff]  ;;  %v51_v32 = vld [vmem:[%s1028_s0 + $0xf8] sm:$0xff] }
   0xc   :  { %561 = vmatmul.msk.f32.gmra.mxu0 %vm57_vm1, %v21_v4  ;;  %626 = vmatpush.msk.msra.mxu3 %vm405_vm2, %v303_v29  ;;  %v35_v33 = vld [vmem:[%s1028_s0 + $0x78] sm:$0xff]  ;;  %v796_v34 = vld [vmem:[%s1029_s2] ss:$0 sm:$0xff] }
   0xd   :  { %592 = vmatpush.msk.msra.mxu1 %vm405_vm2, %v303_v29 }
  0x13   :  { %578 = vmatmul.msk.f32.gmra.mxu2 %vm57_vm1, %v38_v5 }
  0x14   :  { %562 = vmatmul.msk.f32.gmra.mxu0 %vm57_vm1, %v22_v6 }
  0x1b   :  { %579 = vmatmul.msk.f32.gmra.mxu2 %vm57_vm1, %v39_v7 }
  0x1c   :  { %563 = vmatmul.msk.f32.gmra.mxu0 %vm57_vm1, %v23_v8 }
  0x23   :  { %580 = vmatmul.msk.f32.gmra.mxu2 %vm57_vm1, %v40_v9 }
  0x24   :  { %564 = vmatmul.msk.f32.gmra.mxu0 %vm57_vm1, %v24_v10 }
  0x2b   :  { %581 = vmatmul.msk.f32.gmra.mxu2 %vm57_vm1, %v41_v11 }
  0x2c   :  { %565 = vmatmul.msk.f32.gmra.mxu0 %vm57_vm1, %v25_v12 }
  0x33   :  { %582 = vmatmul.msk.f32.gmra.mxu2 %vm57_vm1, %v42_v13 }
  0x34   :  { %566 = vmatmul.msk.f32.gmra.mxu0 %vm57_vm1, %v26_v14 }
  0x3b   :  { %583 = vmatmul.msk.f32.gmra.mxu2 %vm57_vm1, %v43_v15 }
  0x3c   :  { %567 = vmatmul.msk.f32.gmra.mxu0 %vm57_vm1, %v27_v16 }
  0x43   :  { %584 = vmatmul.msk.f32.gmra.mxu2 %vm57_vm1, %v44_v17 }
  0x44   :  { %568 = vmatmul.msk.f32.gmra.mxu0 %vm57_vm1, %v28_v18 }
  0x4b   :  { %585 = vmatmul.msk.f32.gmra.mxu2 %vm57_vm1, %v45_v19 }
  0x4c   :  { %569 = vmatmul.msk.f32.gmra.mxu0 %vm57_vm1, %v29_v20 }
  0x53   :  { %586 = vmatmul.msk.f32.gmra.mxu2 %vm57_vm1, %v46_v21 }
  0x54   :  { %570 = vmatmul.msk.f32.gmra.mxu0 %vm57_vm1, %v30_v22 }
  0x5b   :  { %587 = vmatmul.msk.f32.gmra.mxu2 %vm57_vm1, %v47_v23 }
  0x5c   :  { %571 = vmatmul.msk.f32.gmra.mxu0 %vm57_vm1, %v31_v24 }
  0x63   :  { %588 = vmatmul.msk.f32.gmra.mxu2 %vm57_vm1, %v48_v25 }
  0x64   :  { %572 = vmatmul.msk.f32.gmra.mxu0 %vm57_vm1, %v32_v26 }
  0x6b   :  { %589 = vmatmul.msk.f32.gmra.mxu2 %vm57_vm1, %v49_v27 }
  0x6c   :  { %573 = vmatmul.msk.f32.gmra.mxu0 %vm57_vm1, %v33_v28 }
  0x73   :  { %590 = vmatmul.msk.f32.gmra.mxu2 %vm57_vm1, %v50_v30 }
  0x74   :  { %574 = vmatmul.msk.f32.gmra.mxu0 %vm57_vm1, %v34_v31 }
  0x7b   :  { %591 = vmatmul.msk.f32.gmra.mxu2 %vm57_vm1, %v51_v32 }
  0x7c   :  { %575 = vmatmul.msk.f32.gmra.mxu0 %vm57_vm1, %v35_v33 }
  0x81   :  { %v175_v35 = vpop.f32.mrf.mxu0 }
  0x82   :  { %v176_v36 = vadd.f32 %v796_v34, %v175_v35 }
  0x84   :  { %v271_v37 = vmax.f32 %v176_v36, 0.0 }
  0x86   :  { %593 = vmatmul.msk.f32.vlgmr.msra.gmra.mxu1 %vm308_vm3, %v271_v37  ;;  %v223_v38 = vpop.f32.mrf.mxu2 }
  0x87   :  { %v224_v39 = vadd.f32 %v796_v34, %v223_v38 }
  0x89   :  { %v178_v40 = vpop.f32.mrf.mxu0  ;;  %v287_v41 = vmax.f32 %v224_v39, 0.0 }
  0x8a   :  { %v179_v42 = vadd.f32 %v796_v34, %v178_v40 }
  0x8b   :  { %609 = vmatmul.msk.f32.vlgmr.msra.gmra.mxu3 %vm308_vm3, %v287_v41 }
  0x8c   :  { %v272_v43 = vmax.f32 %v179_v42, 0.0 }
  0x8e   :  { %594 = vmatmul.msk.f32.gmra.mxu1 %vm308_vm3, %v272_v43  ;;  %v226_v44 = vpop.f32.mrf.mxu2 }
  0x8f   :  { %v227_v45 = vadd.f32 %v796_v34, %v226_v44 }
  0x91   :  { %v181_v46 = vpop.f32.mrf.mxu0  ;;  %v288_v47 = vmax.f32 %v227_v45, 0.0 }
  0x92   :  { %v182_v48 = vadd.f32 %v796_v34, %v181_v46 }
  0x93   :  { %610 = vmatmul.msk.f32.gmra.mxu3 %vm308_vm3, %v288_v47 }
  0x94   :  { %v273_v49 = vmax.f32 %v182_v48, 0.0 }
  0x96   :  { %595 = vmatmul.msk.f32.gmra.mxu1 %vm308_vm3, %v273_v49  ;;  %v229_v50 = vpop.f32.mrf.mxu2 }
  0x97   :  { %v230_v51 = vadd.f32 %v796_v34, %v229_v50 }
  0x99   :  { %v184_v52 = vpop.f32.mrf.mxu0  ;;  %v289_v53 = vmax.f32 %v230_v51, 0.0 }
  0x9a   :  { %v185_v54 = vadd.f32 %v796_v34, %v184_v52 }
  0x9b   :  { %611 = vmatmul.msk.f32.gmra.mxu3 %vm308_vm3, %v289_v53 }
  0x9c   :  { %v274_v55 = vmax.f32 %v185_v54, 0.0 }
  0x9e   :  { %596 = vmatmul.msk.f32.gmra.mxu1 %vm308_vm3, %v274_v55  ;;  %v232_v56 = vpop.f32.mrf.mxu2 }
  0x9f   :  { %v233_v57 = vadd.f32 %v796_v34, %v232_v56 }
  0xa1   :  { %v187_v58 = vpop.f32.mrf.mxu0  ;;  %v290_v59 = vmax.f32 %v233_v57, 0.0 }
  0xa2   :  { %v188_v60 = vadd.f32 %v796_v34, %v187_v58 }
  0xa3   :  { %612 = vmatmul.msk.f32.gmra.mxu3 %vm308_vm3, %v290_v59 }
  0xa4   :  { %v275_v61 = vmax.f32 %v188_v60, 0.0 }
  0xa6   :  { %597 = vmatmul.msk.f32.gmra.mxu1 %vm308_vm3, %v275_v61  ;;  %v235_v62 = vpop.f32.mrf.mxu2 }
  0xa7   :  { %v236_v63 = vadd.f32 %v796_v34, %v235_v62 }
  0xa9   :  { %v190_v0 = vpop.f32.mrf.mxu0  ;;  %v291_v1 = vmax.f32 %v236_v63, 0.0 }
  0xaa   :  { %v191_v2 = vadd.f32 %v796_v34, %v190_v0 }
  0xab   :  { %613 = vmatmul.msk.f32.gmra.mxu3 %vm308_vm3, %v291_v1 }
  0xac   :  { %v276_v3 = vmax.f32 %v191_v2, 0.0 }
  0xae   :  { %598 = vmatmul.msk.f32.gmra.mxu1 %vm308_vm3, %v276_v3  ;;  %v238_v4 = vpop.f32.mrf.mxu2  ;;  %v864_v3 = vld [vmem:[%s1031_s4] ss:$0 sm:$0xff] }
  0xaf   :  { %v239_v5 = vadd.f32 %v796_v34, %v238_v4 }
  0xb1   :  { %v193_v6 = vpop.f32.mrf.mxu0  ;;  %v292_v7 = vmax.f32 %v239_v5, 0.0 }
  0xb2   :  { %v194_v8 = vadd.f32 %v796_v34, %v193_v6 }
  0xb3   :  { %614 = vmatmul.msk.f32.gmra.mxu3 %vm308_vm3, %v292_v7 }
  0xb4   :  { %v277_v9 = vmax.f32 %v194_v8, 0.0 }
  0xb6   :  { %599 = vmatmul.msk.f32.gmra.mxu1 %vm308_vm3, %v277_v9  ;;  %v241_v10 = vpop.f32.mrf.mxu2 }
  0xb7   :  { %v242_v11 = vadd.f32 %v796_v34, %v241_v10 }
  0xb9   :  { %v196_v12 = vpop.f32.mrf.mxu0  ;;  %v293_v13 = vmax.f32 %v242_v11, 0.0 }
  0xba   :  { %v197_v14 = vadd.f32 %v796_v34, %v196_v12 }
  0xbb   :  { %615 = vmatmul.msk.f32.gmra.mxu3 %vm308_vm3, %v293_v13 }
  0xbc   :  { %v278_v15 = vmax.f32 %v197_v14, 0.0 }
  0xbe   :  { %600 = vmatmul.msk.f32.gmra.mxu1 %vm308_vm3, %v278_v15  ;;  %v244_v16 = vpop.f32.mrf.mxu2 }
  0xbf   :  { %v245_v17 = vadd.f32 %v796_v34, %v244_v16 }
  0xc1   :  { %v199_v18 = vpop.f32.mrf.mxu0  ;;  %v294_v19 = vmax.f32 %v245_v17, 0.0 }
  0xc2   :  { %v200_v20 = vadd.f32 %v796_v34, %v199_v18 }
  0xc3   :  { %616 = vmatmul.msk.f32.gmra.mxu3 %vm308_vm3, %v294_v19 }
  0xc4   :  { %v279_v21 = vmax.f32 %v200_v20, 0.0 }
  0xc6   :  { %601 = vmatmul.msk.f32.gmra.mxu1 %vm308_vm3, %v279_v21  ;;  %v247_v22 = vpop.f32.mrf.mxu2 }
  0xc7   :  { %v248_v23 = vadd.f32 %v796_v34, %v247_v22 }
  0xc9   :  { %v202_v24 = vpop.f32.mrf.mxu0  ;;  %v295_v25 = vmax.f32 %v248_v23, 0.0 }
  0xca   :  { %v203_v26 = vadd.f32 %v796_v34, %v202_v24 }
  0xcb   :  { %617 = vmatmul.msk.f32.gmra.mxu3 %vm308_vm3, %v295_v25 }
  0xcc   :  { %v280_v27 = vmax.f32 %v203_v26, 0.0 }
  0xce   :  { %602 = vmatmul.msk.f32.gmra.mxu1 %vm308_vm3, %v280_v27  ;;  %v250_v28 = vpop.f32.mrf.mxu2 }
  0xcf   :  { %v251_v29 = vadd.f32 %v796_v34, %v250_v28 }
  0xd1   :  { %v205_v30 = vpop.f32.mrf.mxu0  ;;  %v296_v31 = vmax.f32 %v251_v29, 0.0 }
  0xd2   :  { %v206_v32 = vadd.f32 %v796_v34, %v205_v30 }
  0xd3   :  { %618 = vmatmul.msk.f32.gmra.mxu3 %vm308_vm3, %v296_v31 }
  0xd4   :  { %v281_v33 = vmax.f32 %v206_v32, 0.0 }
  0xd6   :  { %603 = vmatmul.msk.f32.gmra.mxu1 %vm308_vm3, %v281_v33  ;;  %v253_v35 = vpop.f32.mrf.mxu2 }
  0xd7   :  { %v254_v36 = vadd.f32 %v796_v34, %v253_v35 }
  0xd9   :  { %v208_v37 = vpop.f32.mrf.mxu0  ;;  %v297_v38 = vmax.f32 %v254_v36, 0.0 }
  0xda   :  { %v209_v39 = vadd.f32 %v796_v34, %v208_v37 }
  0xdb   :  { %619 = vmatmul.msk.f32.gmra.mxu3 %vm308_vm3, %v297_v38 }
  0xdc   :  { %v282_v40 = vmax.f32 %v209_v39, 0.0 }
  0xde   :  { %604 = vmatmul.msk.f32.gmra.mxu1 %vm308_vm3, %v282_v40  ;;  %v256_v41 = vpop.f32.mrf.mxu2 }
  0xdf   :  { %v257_v42 = vadd.f32 %v796_v34, %v256_v41 }
  0xe1   :  { %v211_v43 = vpop.f32.mrf.mxu0  ;;  %v298_v44 = vmax.f32 %v257_v42, 0.0 }
  0xe2   :  { %v212_v45 = vadd.f32 %v796_v34, %v211_v43 }
  0xe3   :  { %620 = vmatmul.msk.f32.gmra.mxu3 %vm308_vm3, %v298_v44 }
  0xe4   :  { %v283_v46 = vmax.f32 %v212_v45, 0.0 }
  0xe6   :  { %605 = vmatmul.msk.f32.gmra.mxu1 %vm308_vm3, %v283_v46  ;;  %v259_v47 = vpop.f32.mrf.mxu2 }
  0xe7   :  { %v260_v48 = vadd.f32 %v796_v34, %v259_v47 }
  0xe9   :  { %v214_v49 = vpop.f32.mrf.mxu0  ;;  %v299_v50 = vmax.f32 %v260_v48, 0.0 }
  0xea   :  { %v215_v51 = vadd.f32 %v796_v34, %v214_v49 }
  0xeb   :  { %621 = vmatmul.msk.f32.gmra.mxu3 %vm308_vm3, %v299_v50 }
  0xec   :  { %v284_v52 = vmax.f32 %v215_v51, 0.0 }
  0xee   :  { %606 = vmatmul.msk.f32.gmra.mxu1 %vm308_vm3, %v284_v52  ;;  %v262_v53 = vpop.f32.mrf.mxu2 }
  0xef   :  { %v263_v54 = vadd.f32 %v796_v34, %v262_v53 }
  0xf1   :  { %v217_v55 = vpop.f32.mrf.mxu0  ;;  %v300_v56 = vmax.f32 %v263_v54, 0.0 }
  0xf2   :  { %v218_v57 = vadd.f32 %v796_v34, %v217_v55 }
  0xf3   :  { %622 = vmatmul.msk.f32.gmra.mxu3 %vm308_vm3, %v300_v56 }
  0xf4   :  { %v285_v58 = vmax.f32 %v218_v57, 0.0 }
  0xf6   :  { %607 = vmatmul.msk.f32.gmra.mxu1 %vm308_vm3, %v285_v58  ;;  %v265_v59 = vpop.f32.mrf.mxu2 }
  0xf7   :  { %v266_v60 = vadd.f32 %v796_v34, %v265_v59 }
  0xf9   :  { %v220_v61 = vpop.f32.mrf.mxu0  ;;  %v301_v62 = vmax.f32 %v266_v60, 0.0 }
  0xfa   :  { %v221_v63 = vadd.f32 %v796_v34, %v220_v61 }
  0xfb   :  { %623 = vmatmul.msk.f32.gmra.mxu3 %vm308_vm3, %v301_v62 }
  0xfc   :  { %v286_v0 = vmax.f32 %v221_v63, 0.0 }
  0xfe   :  { %608 = vmatmul.msk.f32.gmra.mxu1 %vm308_vm3, %v286_v0  ;;  %v268_v1 = vpop.f32.mrf.mxu2 }
  0xff   :  { %v269_v2 = vadd.f32 %v796_v34, %v268_v1 }
 0x101   :  { %v302_v4 = vmax.f32 %v269_v2, 0.0 }
 0x103   :  { %v426_v5 = vpop.f32.mrf.mxu1  ;;  %624 = vmatmul.msk.f32.gmra.mxu3 %vm308_vm3, %v302_v4 }
 0x104   :  { %v427_v6 = vadd.f32 %v864_v3, %v426_v5 }
 0x106   :  { %523 = vst.msk [vmem:[%s1032_s5] sm:$0xff] %vm522_vm4, %v427_v6 }
 0x10b   :  { %v429_v7 = vpop.f32.mrf.mxu1 }
 0x10c   :  { %v430_v34 = vadd.f32 %v864_v3, %v429_v7 }
 0x10e   :  { %524 = vst.msk [vmem:[%s1032_s5 + $0x8] sm:$0xff] %vm522_vm4, %v430_v34  ;;  %v474_v8 = vpop.f32.mrf.mxu3 }
 0x10f   :  { %v475_v9 = vadd.f32 %v864_v3, %v474_v8 }
 0x111   :  { %539 = vst.msk [vmem:[%s1032_s5 + $0x80] sm:$0xff] %vm522_vm4, %v475_v9 }
 0x113   :  { %v432_v10 = vpop.f32.mrf.mxu1 }
 0x114   :  { %v433_v11 = vadd.f32 %v864_v3, %v432_v10 }
 0x116   :  { %525 = vst.msk [vmem:[%s1032_s5 + $0x10] sm:$0xff] %vm522_vm4, %v433_v11  ;;  %v477_v12 = vpop.f32.mrf.mxu3 }
 0x117   :  { %v478_v13 = vadd.f32 %v864_v3, %v477_v12 }
 0x119   :  { %540 = vst.msk [vmem:[%s1032_s5 + $0x88] sm:$0xff] %vm522_vm4, %v478_v13 }
 0x11b   :  { %v435_v14 = vpop.f32.mrf.mxu1 }
 0x11c   :  { %v436_v15 = vadd.f32 %v864_v3, %v435_v14 }
 0x11e   :  { %526 = vst.msk [vmem:[%s1032_s5 + $0x18] sm:$0xff] %vm522_vm4, %v436_v15  ;;  %v480_v16 = vpop.f32.mrf.mxu3 }
 0x11f   :  { %v481_v17 = vadd.f32 %v864_v3, %v480_v16 }
 0x121   :  { %541 = vst.msk [vmem:[%s1032_s5 + $0x90] sm:$0xff] %vm522_vm4, %v481_v17 }
 0x123   :  { %v438_v18 = vpop.f32.mrf.mxu1 }
 0x124   :  { %v439_v19 = vadd.f32 %v864_v3, %v438_v18 }
 0x126   :  { %527 = vst.msk [vmem:[%s1032_s5 + $0x20] sm:$0xff] %vm522_vm4, %v439_v19  ;;  %v483_v20 = vpop.f32.mrf.mxu3 }
 0x127   :  { %v484_v21 = vadd.f32 %v864_v3, %v483_v20 }
 0x129   :  { %542 = vst.msk [vmem:[%s1032_s5 + $0x98] sm:$0xff] %vm522_vm4, %v484_v21 }
 0x12b   :  { %v441_v22 = vpop.f32.mrf.mxu1 }
 0x12c   :  { %v442_v23 = vadd.f32 %v864_v3, %v441_v22 }
 0x12e   :  { %528 = vst.msk [vmem:[%s1032_s5 + $0x28] sm:$0xff] %vm522_vm4, %v442_v23  ;;  %v486_v24 = vpop.f32.mrf.mxu3 }
 0x12f   :  { %v487_v25 = vadd.f32 %v864_v3, %v486_v24 }
 0x131   :  { %543 = vst.msk [vmem:[%s1032_s5 + $0xa0] sm:$0xff] %vm522_vm4, %v487_v25 }
 0x133   :  { %v444_v26 = vpop.f32.mrf.mxu1 }
 0x134   :  { %v445_v27 = vadd.f32 %v864_v3, %v444_v26 }
 0x136   :  { %529 = vst.msk [vmem:[%s1032_s5 + $0x30] sm:$0xff] %vm522_vm4, %v445_v27  ;;  %v489_v28 = vpop.f32.mrf.mxu3 }
 0x137   :  { %v490_v29 = vadd.f32 %v864_v3, %v489_v28 }
 0x139   :  { %544 = vst.msk [vmem:[%s1032_s5 + $0xa8] sm:$0xff] %vm522_vm4, %v490_v29 }
 0x13b   :  { %v447_v30 = vpop.f32.mrf.mxu1 }
 0x13c   :  { %v448_v31 = vadd.f32 %v864_v3, %v447_v30 }
 0x13e   :  { %530 = vst.msk [vmem:[%s1032_s5 + $0x38] sm:$0xff] %vm522_vm4, %v448_v31  ;;  %v492_v32 = vpop.f32.mrf.mxu3 }
 0x13f   :  { %v493_v33 = vadd.f32 %v864_v3, %v492_v32 }
 0x141   :  { %545 = vst.msk [vmem:[%s1032_s5 + $0xb0] sm:$0xff] %vm522_vm4, %v493_v33 }
 0x143   :  { %v450_v35 = vpop.f32.mrf.mxu1 }
 0x144   :  { %v451_v36 = vadd.f32 %v864_v3, %v450_v35 }
 0x146   :  { %531 = vst.msk [vmem:[%s1032_s5 + $0x40] sm:$0xff] %vm522_vm4, %v451_v36  ;;  %v495_v37 = vpop.f32.mrf.mxu3 }
 0x147   :  { %v496_v38 = vadd.f32 %v864_v3, %v495_v37 }
 0x149   :  { %546 = vst.msk [vmem:[%s1032_s5 + $0xb8] sm:$0xff] %vm522_vm4, %v496_v38 }
 0x14b   :  { %v453_v39 = vpop.f32.mrf.mxu1 }
 0x14c   :  { %v454_v40 = vadd.f32 %v864_v3, %v453_v39 }
 0x14e   :  { %532 = vst.msk [vmem:[%s1032_s5 + $0x48] sm:$0xff] %vm522_vm4, %v454_v40  ;;  %v498_v41 = vpop.f32.mrf.mxu3 }
 0x14f   :  { %v499_v42 = vadd.f32 %v864_v3, %v498_v41 }
 0x151   :  { %547 = vst.msk [vmem:[%s1032_s5 + $0xc0] sm:$0xff] %vm522_vm4, %v499_v42 }
 0x153   :  { %v456_v43 = vpop.f32.mrf.mxu1 }
 0x154   :  { %v457_v44 = vadd.f32 %v864_v3, %v456_v43 }
 0x156   :  { %533 = vst.msk [vmem:[%s1032_s5 + $0x50] sm:$0xff] %vm522_vm4, %v457_v44  ;;  %v501_v45 = vpop.f32.mrf.mxu3 }
 0x157   :  { %v502_v46 = vadd.f32 %v864_v3, %v501_v45 }
 0x159   :  { %548 = vst.msk [vmem:[%s1032_s5 + $0xc8] sm:$0xff] %vm522_vm4, %v502_v46 }
 0x15b   :  { %v459_v47 = vpop.f32.mrf.mxu1 }
 0x15c   :  { %v460_v48 = vadd.f32 %v864_v3, %v459_v47 }
 0x15e   :  { %534 = vst.msk [vmem:[%s1032_s5 + $0x58] sm:$0xff] %vm522_vm4, %v460_v48  ;;  %v504_v49 = vpop.f32.mrf.mxu3 }
 0x15f   :  { %v505_v50 = vadd.f32 %v864_v3, %v504_v49 }
 0x161   :  { %549 = vst.msk [vmem:[%s1032_s5 + $0xd0] sm:$0xff] %vm522_vm4, %v505_v50 }
 0x163   :  { %v462_v51 = vpop.f32.mrf.mxu1 }
 0x164   :  { %v463_v52 = vadd.f32 %v864_v3, %v462_v51 }
 0x166   :  { %535 = vst.msk [vmem:[%s1032_s5 + $0x60] sm:$0xff] %vm522_vm4, %v463_v52  ;;  %v507_v53 = vpop.f32.mrf.mxu3 }
 0x167   :  { %v508_v54 = vadd.f32 %v864_v3, %v507_v53 }
 0x169   :  { %550 = vst.msk [vmem:[%s1032_s5 + $0xd8] sm:$0xff] %vm522_vm4, %v508_v54 }
 0x16b   :  { %v465_v55 = vpop.f32.mrf.mxu1 }
 0x16c   :  { %v466_v56 = vadd.f32 %v864_v3, %v465_v55 }
 0x16e   :  { %536 = vst.msk [vmem:[%s1032_s5 + $0x68] sm:$0xff] %vm522_vm4, %v466_v56  ;;  %v510_v57 = vpop.f32.mrf.mxu3 }
 0x16f   :  { %v511_v58 = vadd.f32 %v864_v3, %v510_v57 }
 0x171   :  { %551 = vst.msk [vmem:[%s1032_s5 + $0xe0] sm:$0xff] %vm522_vm4, %v511_v58 }
 0x173   :  { %v468_v59 = vpop.f32.mrf.mxu1 }
 0x174   :  { %v469_v60 = vadd.f32 %v864_v3, %v468_v59 }
 0x176   :  { %537 = vst.msk [vmem:[%s1032_s5 + $0x70] sm:$0xff] %vm522_vm4, %v469_v60  ;;  %v513_v61 = vpop.f32.mrf.mxu3 }
 0x177   :  { %v514_v62 = vadd.f32 %v864_v3, %v513_v61 }
 0x179   :  { %552 = vst.msk [vmem:[%s1032_s5 + $0xe8] sm:$0xff] %vm522_vm4, %v514_v62 }
 0x17b   :  { %v471_v63 = vpop.f32.mrf.mxu1 }
 0x17c   :  { %v472_v0 = vadd.f32 %v864_v3, %v471_v63 }
 0x17e   :  { %538 = vst.msk [vmem:[%s1032_s5 + $0x78] sm:$0xff] %vm522_vm4, %v472_v0  ;;  %v516_v1 = vpop.f32.mrf.mxu3 }
 0x17f   :  { %v517_v2 = vadd.f32 %v864_v3, %v516_v1 }
 0x181   :  { %553 = vst.msk [vmem:[%s1032_s5 + $0xf0] sm:$0xff] %vm522_vm4, %v517_v2 }
 0x186   :  { %v519_v4 = vpop.f32.mrf.mxu3 }
 0x187   :  { %v520_v5 = vadd.f32 %v864_v3, %v519_v4 }
 0x189   :  { %554 = vst.msk [vmem:[%s1032_s5 + $0xf8] sm:$0xff] %vm522_vm4, %v520_v5 }

</bundles_post_ra>
